<compile_context>
chip_gen: v7x
topology: tpu7x:2x2x1
jax: 0.10.0
libtpu: 0.0.40
codegen_flags: <defaults>
</compile_context>

<pallas_src>
import math
import numpy as np

import jax
import jax.numpy as jnp
from jax.experimental import pallas as pl
from jax.experimental.pallas import tpu as pltpu


def _fir_up_matrix(n_in, n_out, kf, up, pad0):
    """Banded matrix m with m[i, o] = kf[i*up + pad0 - o] (0 outside the kernel)."""
    kt = len(kf)
    m = np.zeros((n_in, n_out), np.float32)
    for i in range(n_in):
        for o in range(n_out):
            t = i * up + pad0 - o
            if 0 <= t < kt:
                m[i, o] = kf[t]
    return m


def _upsample_kernel(x_ref, mh_ref, mw_ref, o_ref, tmp_ref):
    # x_ref  : [tb*H, W]       tb whole images, rows flattened
    # mh_ref : [H_out, H]      resident FIR matrix (height)
    # mw_ref : [W, W_out]      resident FIR matrix (width)
    # o_ref  : [tb*H_out, W_out]
    # tmp_ref: [tb*H, W_out]   VMEM scratch for the intermediate
    h_out, h = mh_ref.shape
    tb = x_ref.shape[0] // h

    m_w = mw_ref[...]
    m_h = mh_ref[...]

    # W contraction for the whole block as a single MXU matmul (effective M = tb*H).
    tmp_ref[...] = jax.lax.dot_general(
        x_ref[...].astype(m_w.dtype), m_w,
        dimension_numbers=(((1,), (0,)), ((), ())),
        preferred_element_type=jnp.float32,
    ).astype(tmp_ref.dtype)

    # H contraction per image; fori_loop (not a Python unroll) bounds live ranges.
    def body(b, carry):
        r_in = pl.multiple_of(b * h, h)
        r_out = pl.multiple_of(b * h_out, h_out)
        t = tmp_ref[pl.ds(r_in, h), :]                       # [H, W_out]
        out = jax.lax.dot_general(                           # [H_out, W_out]
            m_h, t,
            dimension_numbers=(((1,), (0,)), ((), ())),
            preferred_element_type=jnp.float32,
        )
        o_ref[pl.ds(r_out, h_out), :] = out.astype(o_ref.dtype)
        return carry

    jax.lax.fori_loop(0, tb, body, 0)


def _round_up(a, b):
    return -(-a // b) * b


def _vmem_capacity_bytes():
    try:
        return int(pltpu.get_tpu_info().vmem_capacity_bytes)
    except Exception:
        # Conservative fallback: true for v7x, a lower bound for v5e/v6e (128 MiB).
        return 64 * 1024 * 1024


def _pick_batch_tile(nc, h, w, h_out, w_out, x_item, tmp_item, m_item, budget_bytes):
    """Largest image-block size tb that fits the VMEM budget, honoring (8,128) tiling."""
    # Per-image VMEM: double-buffered in/out blocks (lane-padded to 128) + intermediate.
    per_img = (h * _round_up(w, 128) * x_item * 2
               + h_out * _round_up(w_out, 128) * x_item * 2
               + h * _round_up(w_out, 128) * tmp_item)
    # Resident FIR matrices (default double-buffered; tiny vs. the image blocks at
    # typical StyleGAN sizes, so we keep the default rather than Buffered(1)).
    fixed = (_round_up(h_out, 8) * _round_up(h, 128)
             + _round_up(w, 8) * _round_up(w_out, 128)) * m_item * 2
    avail = max(budget_bytes - fixed, per_img)
    tb = max(1, avail // per_img)
    # >= 2 grid steps: lets v7x's two TensorCores both get work and keeps the
    # pipeline overlapped on every generation.
    if nc >= 2:
        tb = min(tb, -(-nc // 2))
    tb = min(tb, nc)
    if tb < nc:
        # Block row counts (tb*H and tb*H_out) must be multiples of 8 sublanes.
        g = max(8 // math.gcd(h, 8), 8 // math.gcd(h_out, 8))
        tb = max(g, (tb // g) * g)
        tb = min(tb, nc)
    # TODO(synk): add a banded row-tiling (H halo / reduction) path so a single huge
    # image that exceeds the VMEM budget (e.g. 1024x1024 f32 on v7x's 64 MiB) is split
    # spatially instead of relying on the raised vmem_limit_bytes.
    return int(tb)


def upsample(x, kernel=(1, 3, 3, 1), factor=2):
    """Pallas implementation of Upsample.forward. x: [N, C, H, W]."""
    n, c, h, w = x.shape
    k1 = np.asarray(kernel, np.float64)
    assert k1.ndim == 1, "Upsample module always builds the 2-D blur from a 1-D kernel"
    kt = k1.shape[0]
    p = kt - factor
    pad0 = (p + 1) // 2 + factor - 1
    pad1 = p // 2
    assert pad0 >= 0 and pad1 >= 0, "factor > len(kernel) (negative pad) is unsupported"

    h_out = h * factor + pad0 + pad1 - kt + 1
    w_out = w * factor + pad0 + pad1 - kt + 1

    # Normalized + flipped 1-D kernel; outer(k1n, k1n) == make_kernel(k) * factor**2.
    k1n = k1 / k1.sum() * factor
    kf = k1n[::-1]

    # bf16 inputs -> bf16 FIR matrices / intermediate (packed MXU rate, half VMEM);
    # accumulation stays f32 via preferred_element_type.
    if x.dtype == jnp.bfloat16:
        m_dtype = jnp.bfloat16
        tmp_dtype = jnp.bfloat16
    else:
        m_dtype = jnp.float32
        tmp_dtype = jnp.float32

    m_w = jnp.asarray(_fir_up_matrix(w, w_out, kf, factor, pad0), dtype=m_dtype)    # [W, W_out]
    m_h = jnp.asarray(_fir_up_matrix(h, h_out, kf, factor, pad0).T, dtype=m_dtype)  # [H_out, H]

    nc = n * c
    # Contiguous-merge reshape: free (metadata only). A block of tb images is a fully
    # contiguous row range of this slab -> dense HBM DMAs on read and write.
    x_flat = x.reshape(nc * h, w)

    vmem_cap = _vmem_capacity_bytes()
    budget = int(vmem_cap * 0.70)        # block-sizing budget
    vmem_limit = int(vmem_cap * 0.85)    # scoped-VMEM limit handed to the compiler

    x_item = jnp.dtype(x.dtype).itemsize
    tmp_item = jnp.dtype(tmp_dtype).itemsize
    m_item = jnp.dtype(m_dtype).itemsize
    tb = _pick_batch_tile(nc, h, w, h_out, w_out, x_item, tmp_item, m_item, budget)
    grid = pl.cdiv(nc, tb)               # non-divisible tails are masked by Pallas

    flops = 2 * nc * h * w * w_out + 2 * nc * h_out * h * w_out
    bytes_accessed = (nc * (h * w + h_out * w_out) * x_item
                      + (h_out * h + w * w_out) * m_item)

    out_flat = pl.pallas_call(
        _upsample_kernel,
        out_shape=jax.ShapeDtypeStruct((nc * h_out, w_out), x.dtype),
        grid=(grid,),
        in_specs=[
            pl.BlockSpec((tb * h, w), lambda i: (i, 0)),
            pl.BlockSpec((h_out, h), lambda i: (0, 0)),
            pl.BlockSpec((w, w_out), lambda i: (0, 0)),
        ],
        out_specs=pl.BlockSpec((tb * h_out, w_out), lambda i: (i, 0)),
        scratch_shapes=[pltpu.VMEM((tb * h, w_out), tmp_dtype)],
        compiler_params=pltpu.CompilerParams(
            dimension_semantics=("parallel",),
            vmem_limit_bytes=vmem_limit),
        cost_estimate=pl.CostEstimate(
            flops=flops, transcendentals=0, bytes_accessed=bytes_accessed),
    )(x_flat, m_h, m_w)

    return out_flat.reshape(n, c, h_out, w_out)


def _upsample_ref_np(x, kernel=(1, 3, 3, 1), factor=2):
    """Exact float64 reference following upfirdn2d_native (non-negative pads)."""
    x = np.asarray(x, np.float64)
    k1 = np.asarray(kernel, np.float64)
    k2 = np.outer(k1, k1)
    k2 = k2 / k2.sum() * factor ** 2
    kt = k2.shape[0]
    p = kt - factor
    pad0 = (p + 1) // 2 + factor - 1
    pad1 = p // 2
    n, c, h, w = x.shape
    hp = h * factor + pad0 + pad1
    wp = w * factor + pad0 + pad1
    up = np.zeros((n, c, hp, wp), np.float64)
    up[:, :, pad0:pad0 + h * factor:factor, pad0:pad0 + w * factor:factor] = x
    kflip = k2[::-1, ::-1]
    h_out = hp - kt + 1
    w_out = wp - kt + 1
    out = np.zeros((n, c, h_out, w_out), np.float64)
    for dy in range(kt):
        for dx in range(kt):
            out += kflip[dy, dx] * up[:, :, dy:dy + h_out, dx:dx + w_out]
    return out


if __name__ == "__main__":
    key = jax.random.PRNGKey(0)
    n, c, h, w = 2, 4, 16, 16
    factor = 2
    kernel = (1, 3, 3, 1)

    x = jax.random.normal(key, (n, c, h, w), dtype=jnp.float32)

    out = upsample(x, kernel=kernel, factor=factor)
    out = jax.block_until_ready(out)

    ref = _upsample_ref_np(np.asarray(x), kernel=kernel, factor=factor)

    assert out.shape == (n, c, h * factor, w * factor), out.shape
    assert np.allclose(np.asarray(out), ref, atol=1e-4, rtol=1e-4), \
        float(np.max(np.abs(np.asarray(out) - ref)))

    print("KERNEL_OK")
</pallas_src>

<mosaic_0001>
module attributes {stable_mosaic.version = 11 : i64} {
  func.func @_upsample_kernel(%arg0: i32, %arg1: memref<64x16xf32, #tpu.memory_space<vmem>>, %arg2: memref<32x16xf32, #tpu.memory_space<vmem>>, %arg3: memref<16x32xf32, #tpu.memory_space<vmem>>, %arg4: memref<128x32xf32, #tpu.memory_space<vmem>>, %arg5: memref<64x32xf32, #tpu.memory_space<vmem>>) attributes {dimension_semantics = [#tpu.dimension_semantics<parallel>], iteration_bounds = array<i64: 2>, scalar_prefetch = 0 : i64, scratch_operands = 1 : i64, tpu.core_type = #tpu.core_type<tc>, window_params = [{transform_indices = @transform_0, window_bounds = array<i64: 64, 16>}, {pipeline_mode = #tpu.pipeline_mode<synchronous>, transform_indices = @transform_1, window_bounds = array<i64: 32, 16>}, {pipeline_mode = #tpu.pipeline_mode<synchronous>, transform_indices = @transform_2, window_bounds = array<i64: 16, 32>}, {transform_indices = @transform_3, window_bounds = array<i64: 128, 32>}]} {
    %c0 = arith.constant 0 : index
    %c0_0 = arith.constant 0 : index
    %0 = vector.load %arg3[%c0, %c0_0] : memref<16x32xf32, #tpu.memory_space<vmem>>, vector<16x32xf32>
    %c0_1 = arith.constant 0 : index
    %c0_2 = arith.constant 0 : index
    %1 = vector.load %arg2[%c0_1, %c0_2] : memref<32x16xf32, #tpu.memory_space<vmem>>, vector<32x16xf32>
    %c0_3 = arith.constant 0 : index
    %c0_4 = arith.constant 0 : index
    %2 = vector.load %arg1[%c0_3, %c0_4] : memref<64x16xf32, #tpu.memory_space<vmem>>, vector<64x16xf32>
    %cst = arith.constant dense<0.000000e+00> : vector<64x32xf32>
    %3 = tpu.matmul %2, %0, %cst {dimension_numbers = #tpu.dot_dimension_numbers<[1], [0], [0], [1], [0, 0, 1, 1], [], []>} : vector<64x16xf32>, vector<16x32xf32>, vector<64x32xf32> -> vector<64x32xf32>
    %c0_5 = arith.constant 0 : index
    %c0_6 = arith.constant 0 : index
    %4 = vector.load %arg5[%c0_5, %c0_6] : memref<64x32xf32, #tpu.memory_space<vmem>>, vector<64x32xf32>
    tpu.vector_store %arg5[%c0_5, %c0_6], %3 {strides = array<i32>} : memref<64x32xf32, #tpu.memory_space<vmem>>, vector<64x32xf32>,
    %c0_i32 = arith.constant 0 : i32
    %c4_i32 = arith.constant 4 : i32
    %5 = arith.addi %c0_i32, %c4_i32 : i32
    %c1_i32 = arith.constant 1 : i32
    scf.for %arg6 = %c0_i32 to %5 step %c1_i32  : i32 {
      %c16_i32 = arith.constant 16 : i32
      %6 = arith.muli %arg6, %c16_i32 : i32
      %7 = tpu.assume_multiple %6, 16 : i32
      %c32_i32 = arith.constant 32 : i32
      %8 = arith.muli %arg6, %c32_i32 : i32
      %9 = tpu.assume_multiple %8, 32 : i32
      %10 = arith.index_cast %7 : i32 to index
      %c0_8 = arith.constant 0 : index
      %11 = vector.load %arg5[%10, %c0_8] : memref<64x32xf32, #tpu.memory_space<vmem>>, vector<16x32xf32>
      %cst_9 = arith.constant dense<0.000000e+00> : vector<32x32xf32>
      %12 = tpu.matmul %1, %11, %cst_9 {dimension_numbers = #tpu.dot_dimension_numbers<[1], [0], [0], [1], [0, 0, 1, 1], [], []>} : vector<32x16xf32>, vector<16x32xf32>, vector<32x32xf32> -> vector<32x32xf32>
      %13 = arith.index_cast %9 : i32 to index
      %c0_10 = arith.constant 0 : index
      %14 = vector.load %arg4[%13, %c0_10] : memref<128x32xf32, #tpu.memory_space<vmem>>, vector<32x32xf32>
      tpu.vector_store %arg4[%13, %c0_10], %12 {strides = array<i32>} : memref<128x32xf32, #tpu.memory_space<vmem>>, vector<32x32xf32>,
    }
    %c4_i32_7 = arith.constant 4 : i32
    return
  }
  func.func @transform_0(%arg0: i32) -> (i32, i32) {
    %c0_i32 = arith.constant 0 : i32
    %c0_i32_0 = arith.constant 0 : i32
    return %arg0, %c0_i32 : i32, i32
  }
  func.func @transform_1(%arg0: i32) -> (i32, i32) {
    %c0_i32 = arith.constant 0 : i32
    %c0_i32_0 = arith.constant 0 : i32
    %c0_i32_1 = arith.constant 0 : i32
    return %c0_i32, %c0_i32_0 : i32, i32
  }
  func.func @transform_2(%arg0: i32) -> (i32, i32) {
    %c0_i32 = arith.constant 0 : i32
    %c0_i32_0 = arith.constant 0 : i32
    %c0_i32_1 = arith.constant 0 : i32
    return %c0_i32, %c0_i32_0 : i32, i32
  }
  func.func @transform_3(%arg0: i32) -> (i32, i32) {
    %c0_i32 = arith.constant 0 : i32
    %c0_i32_0 = arith.constant 0 : i32
    return %arg0, %c0_i32 : i32, i32
  }
}

</mosaic_0001>

<bundles_post_ra>
// kernel: tpu_custom_call.1
= control target key start
LH: loop header
LB: loop body
LE: loop exit
PB: predicated region body
PF: predicated region fallthrough
CT: control target
= control target key end

     0   :  { %s636_s12 = smov 0   ;;  %s715_s0 = inlined_call_operand.vmem [shape: f32[128,16], index: 0, kind: input, shape index: {}]   ;;  %s716_s1 = inlined_call_operand.vmem [shape: f32[32,16], index: 1, kind: input, shape index: {}]   ;;  %s717_s2 = inlined_call_operand.vmem [shape: f32[16,32], index: 2, kind: input, shape index: {}]   ;;  %s718_s3 = inlined_call_operand.vmem [shape: f32[256,32], index: 3, kind: output, shape index: {}]  }
   0x1 LB: > { %s505_s13 = sadd.s32 4294967295, %s610_s12   ;;  %p509_p0 = scmp.ge.s32.totalorder %s610_s12, 1  ;;  %s610_s12 = sphi %s636_s12, %s13_s12  }
   0x2   : > { %p138_p1 = scmp.lt.s32.totalorder %s610_s12, 3 }
   0x4   : > { %p139_p2 = pnand %p509_p0, %p138_p1 }
   0x5   : > { %s512_s14 = sshll.u32 (!%p139_p2), %s505_s13, 4  ;;  %v174_v0 = vld [vmem:[%s717_s2] sm:$0xff] (!%p139_p2)  ;;  %v175_v1 = vld [vmem:[%s717_s2 + $0x8] sm:$0xff] (!%p139_p2)  ;;  %s510_s21 = sshll.u32 (!%p139_p2), %s505_s13, 3  ;;  %v663_v4 = vld [vmem:[%s716_s1 + $0x10] sm:$0xff] (!%p139_p2)  ;;  %vm188_vm0 = vcmask (!%p139_p2), 130048  }
   0x6   : > { %142 = sbr.rel (%p139_p2) target bundleno = 464 (0x1d0), region = 32  ;;  %v653_v2 = vld [vmem:[%s716_s1] sm:$0xff] (!%p139_p2)  ;;  %p169_p3 = scmp.lt.s32.totalorder (!%p139_p2), %s512_s14, 31  ;;  %v658_v3 = vld [vmem:[%s716_s1 + $0x8] sm:$0xff] (!%p139_p2)  ;;  %v668_v5 = vld [vmem:[%s716_s1 + $0x18] sm:$0xff] (!%p139_p2)  ;;  %v572_v6 = vpack.c.bf16 (!%p139_p2), %v175_v1, %v174_v0  ;;  %vm318_vm1 = vcmask (!%p139_p2), 261120  }
   0x7   : > { %p163_p4 = scmp.lt.s32.totalorder (!%p139_p2), %s510_s21, 15  ;;  %s694_s9 = smov (!%p139_p2), 0  }
   0x8   : > { %573 = vmatprep.subr.bf16.mxu0 (!%p139_p2), %v572_v6  ;;  %580 = vmatprep.subr.bf16.mxu1 (!%p139_p2), %v572_v6 }
   0x9   : > { %575 = vmatpush3.bf16.msra.mxu0 (!%p139_p2), %v572_v6  ;;  %581 = vmatpush3.bf16.msra.mxu1 (!%p139_p2), %v572_v6 }
   0xd   : > { %s720_s14 = smov (!%p169_p3, %s512_s14), 31  ;;  %s722_s21 = smov (!%p163_p4, %s510_s21), 15 }
   0xe   : > { %s513_s28 = sshll.u32 %s720_s14, 3  ;;  %s511_s5 = sshll.u32 %s722_s21, 3 }
   0xf   : > { %s673_s4 = scalar_lea.vmem %s718_s3, %s513_s28  ;;  %s166_s8 = scalar_lea.vmem %s715_s0, %s511_s5 }
  0x10   : > { %v180_v7 = vld [vmem:[%s166_s8] sm:$0xff]  ;;  %v181_v9 = vld [vmem:[%s166_s8 + $0x8] sm:$0xff]  ;;  %v182_v11 = vld [vmem:[%s166_s8 + $0x10] sm:$0xff] }
  0x11   : > { %v184_v8 = vld [vmem:[%s166_s8 + $0x20] sm:$0xff]  ;;  %550 = vmatprep.mubr.msk.f32.mxu0 %vm188_vm0, %v180_v7  ;;  %v185_v10 = vld [vmem:[%s166_s8 + $0x28] sm:$0xff]  ;;  %v186_v12 = vld [vmem:[%s166_s8 + $0x30] sm:$0xff] }
  0x12   : > { %556 = vmatprep.mubr.msk.f32.mxu1 %vm188_vm0, %v184_v8  ;;  %551 = vmatmul.mubr.msk.f32.vlgmr.msra.gmra.mrb[0].mxu0 %vm188_vm0, %v181_v9  ;;  %v183_v13 = vld [vmem:[%s166_s8 + $0x18] sm:$0xff] }
  0x13   : > { %557 = vmatmul.mubr.msk.f32.vlgmr.msra.gmra.mrb[0].mxu1 %vm188_vm0, %v185_v10  ;;  %553 = vmatprep.mubr.msk.f32.mxu0 %vm188_vm0, %v182_v11  ;;  %v187_v14 = vld [vmem:[%s166_s8 + $0x38] sm:$0xff] }
  0x14   : > { %559 = vmatprep.mubr.msk.f32.mxu1 %vm188_vm0, %v186_v12 }
  0x16   : > { %554 = vmatmul.mubr.msk.f32.gmra.mrb[2].mxu0 %vm188_vm0, %v183_v13 }
  0x17   : > { %560 = vmatmul.mubr.msk.f32.gmra.mrb[2].mxu1 %vm188_vm0, %v187_v14 }
  0xe5   : > { %v552_v15 = vpop.f32.mrb[0].mxu0 }
  0xe6   : > { %v558_v16 = vpop.f32.mrb[0].mxu1  ;;  %320 = vst.msk [vmem:[#allocation2 + $0x8] sm:$0xff] %vm318_vm1, %v552_v15  ;;  %v279_v17 = vpop.f32.mrb[1].mxu0 }
  0xe7   : > { %324 = vst.msk [vmem:[#allocation2 + $0x28] sm:$0xff] %vm318_vm1, %v558_v16  ;;  %v299_v18 = vpop.f32.mrb[1].mxu1  ;;  %319 = vst.msk [vmem:[#allocation2] sm:$0xff] %vm318_vm1, %v279_v17 }
  0xe8   : > { %323 = vst.msk [vmem:[#allocation2 + $0x20] sm:$0xff] %vm318_vm1, %v299_v18 }
  0xe9   : > { %v555_v19 = vpop.f32.mrb[2].mxu0 }
  0xea   : > { %v561_v20 = vpop.f32.mrb[2].mxu1  ;;  %322 = vst.msk [vmem:[#allocation2 + $0x18] sm:$0xff] %vm318_vm1, %v555_v19  ;;  %v289_v21 = vpop.f32.mrb[3].mxu0 }
  0xeb   : > { %326 = vst.msk [vmem:[#allocation2 + $0x38] sm:$0xff] %vm318_vm1, %v561_v20  ;;  %v309_v22 = vpop.f32.mrb[3].mxu1  ;;  %321 = vst.msk [vmem:[#allocation2 + $0x10] sm:$0xff] %vm318_vm1, %v289_v21 }
  0xec   : > { %325 = vst.msk [vmem:[#allocation2 + $0x30] sm:$0xff] %vm318_vm1, %v309_v22 }
  0xed LB: >> { %566 = vmatprep.mubr.msk.f32.mxu0 %vm188_vm0, %v653_v2  ;;  %569 = vmatprep.mubr.msk.f32.mxu1 %vm188_vm0, %v663_v4  ;;  %s522_s10 = sshll.u32 %s614_s9, 4  ;;  %s523_s13 = sshll.u32 %s614_s9, 5  ;;  %s614_s9 = sphi %s694_s9, %s332_s9  }
  0xee   : >> { %s335_s11 = scalar_lea.vmem [#allocation2], %s522_s10  ;;  %s435_s14 = scalar_lea.vmem %s673_s4, %s523_s13 }
  0xef   : >> { %s332_s9 = sadd.s32 1, %s614_s9  }
  0xf0   : >> { %p329_p5 = scmp.ge.s32.totalorder %s332_s9, 4  }
  0xf3   : >> { %v336_v23 = vld [vmem:[%s335_s11] sm:$0xff]  ;;  %v337_v24 = vld [vmem:[%s335_s11 + $0x8] sm:$0xff] }
  0xf4   : >> { %v576_v25 = vpack.c.bf16 %v337_v24, %v336_v23 }
  0xf6   : >> { %577 = vmatprep.subr.bf16.mxu0 %v576_v25  ;;  %582 = vmatprep.subr.bf16.mxu1 %v576_v25 }
  0xf7   : >> { %579 = vmatpush3.bf16.msra.mxu0 %v576_v25  ;;  %583 = vmatpush3.bf16.msra.mxu1 %v576_v25 }
  0xfa   : >> { %567 = vmatmul.mubr.msk.f32.vlgmr.msra.gmra.mrb[0].mxu0 %vm188_vm0, %v658_v3  ;;  %570 = vmatmul.mubr.msk.f32.vlgmr.msra.gmra.mrb[0].mxu1 %vm188_vm0, %v668_v5 }
 0x1c9   : > { %331 = sbr.rel (!%p329_p5) target bundleno = 237 (0xed), region = 71 }
 0x1cd   : >> { %v568_v26 = vpop.f32.mrb[0].mxu0  ;;  %v571_v27 = vpop.f32.mrb[0].mxu1 }
 0x1ce   : >> { %437 = vst.msk [vmem:[%s435_s14 + $0x8] sm:$0xff] %vm318_vm1, %v568_v26  ;;  %439 = vst.msk [vmem:[%s435_s14 + $0x18] sm:$0xff] %vm318_vm1, %v571_v27  ;;  %v416_v28 = vpop.f32.mrb[1].mxu0  ;;  %v426_v29 = vpop.f32.mrb[1].mxu1 }
 0x1cf   : >> { %436 = vst.msk [vmem:[%s435_s14] sm:$0xff] %vm318_vm1, %v416_v28  ;;  %438 = vst.msk [vmem:[%s435_s14 + $0x10] sm:$0xff] %vm318_vm1, %v426_v29 }
 0x1d0 PF: > { %s13_s12 = sadd.s32 1, %s610_s12  }
 0x1d1   : > { %p10_p6 = scmp.ge.s32.totalorder %s13_s12, 4  }
 0x1d3   :  { %12 = sbr.rel (!%p10_p6) target bundleno = 1 (0x1), region = 82 }

</bundles_post_ra>
